<compile_context>
chip_gen: v6e
topology: v6e:2x2x1
jax: 0.10.0
libtpu: 0.0.40
codegen_flags: <defaults>
</compile_context>

<pallas_src>
import jax
import jax.numpy as jnp
from jax.experimental import pallas as pl
from jax.experimental.pallas import tpu as pltpu

NUM_CLASS = 3          # forward() hard-codes labels for classes 0,1,2
SMOOTH = 1e-5          # forward() uses 1e-5 (not self.smooth)

_SUPER = 32            # super-strip rows: aligned native tile for int8/bf16/f32
_MAX_TILE_R = 1024     # rows of 128 lanes per grid step (perf review item 1)


def dice_partial_kernel(pred_ref, gt_ref, out_ref):
    """Per-(batch, spatial-tile) fused softmax + dice partial sums.

    pred_ref: (1, C, tile_r, 128)  logits, model dtype (e.g. bf16)
    gt_ref  : (1, 1, tile_r, 128)  integer labels (e.g. int8)
    out_ref : (1, 1, 72, 128) f32  nine stacked (8,128) accumulators:
              rows  0-23 per-class intersection sum(p_i * [gt==i])
              rows 24-47 per-class softmax sum  sum(p_i)
              rows 48-71 per-class label count  sum([gt==i])
    """
    tile_r = pred_ref.shape[2]
    n_super = tile_r // _SUPER

    def accumulate(x0, x1, x2, g, carry):
        # One (8,128) f32 sub-strip: class-unrolled softmax + fused accumulation.
        i0, i1, i2, z0, z1, z2, y0, y1, y2 = carry
        m = jnp.maximum(jnp.maximum(x0, x1), x2)
        e0 = jnp.exp(x0 - m)
        e1 = jnp.exp(x1 - m)
        e2 = jnp.exp(x2 - m)
        inv = 1.0 / (e0 + e1 + e2)          # exact divide (approx recip breaks 1e-5)
        p0 = e0 * inv
        p1 = e1 * inv
        p2 = e2 * inv
        m0 = g == 0
        m1 = g == 1
        m2 = g == 2
        return (i0 + jnp.where(m0, p0, 0.0),
                i1 + jnp.where(m1, p1, 0.0),
                i2 + jnp.where(m2, p2, 0.0),
                z0 + p0, z1 + p1, z2 + p2,
                y0 + jnp.where(m0, 1.0, 0.0),
                y1 + jnp.where(m1, 1.0, 0.0),
                y2 + jnp.where(m2, 1.0, 0.0))

    def super_body(s, carry):
        # One aligned 32-row load per operand, then four static (8,128) slices.
        r = pl.multiple_of(s * _SUPER, _SUPER)
        x0 = pred_ref[0, 0, pl.ds(r, _SUPER), :].astype(jnp.float32)
        x1 = pred_ref[0, 1, pl.ds(r, _SUPER), :].astype(jnp.float32)
        x2 = pred_ref[0, 2, pl.ds(r, _SUPER), :].astype(jnp.float32)
        g = gt_ref[0, 0, pl.ds(r, _SUPER), :].astype(jnp.int32)
        for k in range(_SUPER // 8):                      # static unroll x4
            sl = slice(8 * k, 8 * (k + 1))
            carry = accumulate(x0[sl], x1[sl], x2[sl], g[sl], carry)
        return carry

    zero = jnp.zeros((8, 128), jnp.float32)
    accs = jax.lax.fori_loop(0, n_super, super_body, (zero,) * 9)

    # Nine aligned, unmasked (8,128) sublane-tile stores (one output write-out).
    for k, acc in enumerate(accs):
        out_ref[0, 0, 8 * k:8 * (k + 1), :] = acc


def _plan_tiles(hw):
    """Choose (tile_r, r_pad): tile_r is a multiple of 32 (<= _MAX_TILE_R) and the
    padded row count r_pad is a multiple of tile_r.  No giant-block fallback."""
    r_needed = -(-hw // 128)
    if r_needed <= _MAX_TILE_R:
        tile_r = max(_SUPER, -(-r_needed // _SUPER) * _SUPER)
        return tile_r, tile_r
    best_t, best_pad = _MAX_TILE_R, None
    for t in range(_MAX_TILE_R, 255, -_SUPER):
        pad_rows = (-r_needed) % t
        if best_pad is None or pad_rows < best_pad:
            best_t, best_pad = t, pad_rows
        if pad_rows == 0:
            break
    return best_t, r_needed + best_pad


@jax.jit
def dice_loss(pred, gt):
    """pred: (B, C, H, W) float logits (any dtype), gt: (B, 1, H, W) int labels."""
    B, C, H, W = pred.shape
    assert C == NUM_CLASS, "forward() only constructs labels for 3 classes"
    hw = H * W
    tile_r, r_pad = _plan_tiles(hw)
    S = r_pad // tile_r
    n_pad = r_pad * 128 - hw

    pred_flat = pred.reshape(B, C, hw)
    gt_flat = gt.reshape(B, 1, hw)
    if n_pad:
        # Pad logits with zeros (softmax -> exactly 1/3 per class, corrected below)
        # and labels with an out-of-range class so they hit no label/intersection.
        pred_flat = jnp.pad(pred_flat, ((0, 0), (0, 0), (0, n_pad)))
        gt_flat = jnp.pad(gt_flat, ((0, 0), (0, 0), (0, n_pad)),
                          constant_values=NUM_CLASS)
    pred4 = pred_flat.reshape(B, C, r_pad, 128)
    gt4 = gt_flat.reshape(B, 1, r_pad, 128)

    partials = pl.pallas_call(
        dice_partial_kernel,
        out_shape=jax.ShapeDtypeStruct((B, S, 9 * 8, 128), jnp.float32),
        grid=(B, S),
        in_specs=[
            pl.BlockSpec((1, C, tile_r, 128), lambda b, s: (b, 0, s, 0)),
            pl.BlockSpec((1, 1, tile_r, 128), lambda b, s: (b, 0, s, 0)),
        ],
        out_specs=pl.BlockSpec((1, 1, 9 * 8, 128), lambda b, s: (b, s, 0, 0)),
        compiler_params=pltpu.CompilerParams(
            dimension_semantics=("parallel", "parallel")),
    )(pred4, gt4)

    # Tiny final combine (9 numbers) in plain JAX.
    sums = jnp.sum(partials, axis=(0, 1, 3)).reshape(9, 8).sum(axis=1)   # (9,)
    inter = sums[0:3]
    z_sum = sums[3:6]
    y_sum = sums[6:9]
    if n_pad:
        z_sum = z_sum - (B * n_pad) / 3.0   # remove padded pixels' softmax (=1/3 each)
    dice = (2.0 * inter + SMOOTH) / (z_sum + y_sum + SMOOTH)
    return 1.0 - jnp.sum(dice) / NUM_CLASS


def dice_loss_ref(pred, gt):
    """Pure-JAX reference mirroring the PyTorch forward()."""
    sm = jax.nn.softmax(pred.astype(jnp.float32), axis=1)
    C = pred.shape[1]
    gt_sq = gt[:, 0].astype(jnp.int32)
    loss = 0.0
    for i in range(C):
        label = (gt_sq == i).astype(jnp.float32)
        intersect = jnp.sum(sm[:, i] * label)
        z_sum = jnp.sum(sm[:, i])
        y_sum = jnp.sum(label)
        loss += (2.0 * intersect + SMOOTH) / (z_sum + y_sum + SMOOTH)
    return 1.0 - loss / C


if __name__ == "__main__":
    key = jax.random.PRNGKey(0)
    k_pred, k_gt = jax.random.split(key)

    B, C, H, W = 2, NUM_CLASS, 16, 16
    # Model-native dtypes: bf16 logits, int8 labels (kernel up-casts per-strip).
    pred = jax.random.normal(k_pred, (B, C, H, W), dtype=jnp.float32).astype(jnp.bfloat16)
    gt = jax.random.randint(k_gt, (B, 1, H, W), 0, NUM_CLASS, dtype=jnp.int32).astype(jnp.int8)

    loss = jax.block_until_ready(dice_loss(pred, gt))
    ref = jax.block_until_ready(dice_loss_ref(pred, gt))

    assert jnp.allclose(loss, ref, atol=1e-5, rtol=1e-5), (loss, ref)
    print("KERNEL_OK")
</pallas_src>

<mosaic_0001>
module attributes {stable_mosaic.version = 11 : i64} {
  func.func @dice_partial_kernel(%arg0: i32, %arg1: i32, %arg2: memref<1x3x32x128xbf16, #tpu.memory_space<vmem>>, %arg3: memref<1x1x32x128xi8, #tpu.memory_space<vmem>>, %arg4: memref<1x1x72x128xf32, #tpu.memory_space<vmem>>) attributes {dimension_semantics = [#tpu.dimension_semantics<parallel>, #tpu.dimension_semantics<parallel>], iteration_bounds = array<i64: 2, 1>, scalar_prefetch = 0 : i64, scratch_operands = 0 : i64, tpu.core_type = #tpu.core_type<tc>, window_params = [{transform_indices = @transform_0, window_bounds = array<i64: 1, 3, 32, 128>}, {transform_indices = @transform_1, window_bounds = array<i64: 1, 1, 32, 128>}, {transform_indices = @transform_2, window_bounds = array<i64: 1, 1, 72, 128>}]} {
    %cst = arith.constant 0.000000e+00 : f32
    %0 = vector.broadcast %cst : f32 to vector<8x128xf32>
    %c0_i32 = arith.constant 0 : i32
    %c32_i32 = arith.constant 32 : i32
    %1 = arith.muli %c0_i32, %c32_i32 : i32
    %2 = tpu.assume_multiple %1, 32 : i32
    %c0 = arith.constant 0 : index
    %c0_0 = arith.constant 0 : index
    %3 = arith.index_cast %2 : i32 to index
    %c0_1 = arith.constant 0 : index
    %4 = vector.load %arg2[%c0, %c0_0, %3, %c0_1] : memref<1x3x32x128xbf16, #tpu.memory_space<vmem>>, vector<1x1x32x128xbf16>
    %5 = vector.shape_cast %4 : vector<1x1x32x128xbf16> to vector<32x128xbf16>
    %6 = arith.extf %5 : vector<32x128xbf16> to vector<32x128xf32>
    %c0_2 = arith.constant 0 : index
    %c1 = arith.constant 1 : index
    %7 = arith.index_cast %2 : i32 to index
    %c0_3 = arith.constant 0 : index
    %8 = vector.load %arg2[%c0_2, %c1, %7, %c0_3] : memref<1x3x32x128xbf16, #tpu.memory_space<vmem>>, vector<1x1x32x128xbf16>
    %9 = vector.shape_cast %8 : vector<1x1x32x128xbf16> to vector<32x128xbf16>
    %10 = arith.extf %9 : vector<32x128xbf16> to vector<32x128xf32>
    %c0_4 = arith.constant 0 : index
    %c2 = arith.constant 2 : index
    %11 = arith.index_cast %2 : i32 to index
    %c0_5 = arith.constant 0 : index
    %12 = vector.load %arg2[%c0_4, %c2, %11, %c0_5] : memref<1x3x32x128xbf16, #tpu.memory_space<vmem>>, vector<1x1x32x128xbf16>
    %13 = vector.shape_cast %12 : vector<1x1x32x128xbf16> to vector<32x128xbf16>
    %14 = arith.extf %13 : vector<32x128xbf16> to vector<32x128xf32>
    %c0_6 = arith.constant 0 : index
    %c0_7 = arith.constant 0 : index
    %15 = arith.index_cast %2 : i32 to index
    %c0_8 = arith.constant 0 : index
    %16 = vector.load %arg3[%c0_6, %c0_7, %15, %c0_8] : memref<1x1x32x128xi8, #tpu.memory_space<vmem>>, vector<1x1x32x128xi8>
    %17 = vector.shape_cast %16 : vector<1x1x32x128xi8> to vector<32x128xi8>
    %18 = arith.extsi %17 : vector<32x128xi8> to vector<32x128xi32>
    %19 = vector.extract_strided_slice %6 {offsets = [0, 0], sizes = [8, 128], strides = [1, 1]} : vector<32x128xf32> to vector<8x128xf32>
    %20 = vector.extract_strided_slice %10 {offsets = [0, 0], sizes = [8, 128], strides = [1, 1]} : vector<32x128xf32> to vector<8x128xf32>
    %21 = vector.extract_strided_slice %14 {offsets = [0, 0], sizes = [8, 128], strides = [1, 1]} : vector<32x128xf32> to vector<8x128xf32>
    %22 = vector.extract_strided_slice %18 {offsets = [0, 0], sizes = [8, 128], strides = [1, 1]} : vector<32x128xi32> to vector<8x128xi32>
    %23 = arith.maximumf %19, %20 : vector<8x128xf32>
    %24 = arith.maximumf %23, %21 : vector<8x128xf32>
    %25 = arith.subf %19, %24 : vector<8x128xf32>
    %26 = math.exp %25 : vector<8x128xf32>
    %27 = arith.subf %20, %24 : vector<8x128xf32>
    %28 = math.exp %27 : vector<8x128xf32>
    %29 = arith.subf %21, %24 : vector<8x128xf32>
    %30 = math.exp %29 : vector<8x128xf32>
    %31 = arith.addf %26, %28 : vector<8x128xf32>
    %32 = arith.addf %31, %30 : vector<8x128xf32>
    %cst_9 = arith.constant 1.000000e+00 : f32
    %33 = vector.broadcast %cst_9 : f32 to vector<8x128xf32>
    %34 = arith.divf %33, %32 : vector<8x128xf32>
    %35 = arith.mulf %26, %34 : vector<8x128xf32>
    %36 = arith.mulf %28, %34 : vector<8x128xf32>
    %37 = arith.mulf %30, %34 : vector<8x128xf32>
    %c0_i32_10 = arith.constant 0 : i32
    %38 = vector.broadcast %c0_i32_10 : i32 to vector<8x128xi32>
    %39 = arith.cmpi eq, %22, %38 : vector<8x128xi32>
    %c1_i32 = arith.constant 1 : i32
    %40 = vector.broadcast %c1_i32 : i32 to vector<8x128xi32>
    %41 = arith.cmpi eq, %22, %40 : vector<8x128xi32>
    %c2_i32 = arith.constant 2 : i32
    %42 = vector.broadcast %c2_i32 : i32 to vector<8x128xi32>
    %43 = arith.cmpi eq, %22, %42 : vector<8x128xi32>
    %cst_11 = arith.constant 0.000000e+00 : f32
    %44 = vector.broadcast %cst_11 : f32 to vector<8x128xf32>
    %45 = arith.select %39, %35, %44 : vector<8x128xi1>, vector<8x128xf32>
    %46 = arith.addf %0, %45 : vector<8x128xf32>
    %cst_12 = arith.constant 0.000000e+00 : f32
    %47 = vector.broadcast %cst_12 : f32 to vector<8x128xf32>
    %48 = arith.select %41, %36, %47 : vector<8x128xi1>, vector<8x128xf32>
    %49 = arith.addf %0, %48 : vector<8x128xf32>
    %cst_13 = arith.constant 0.000000e+00 : f32
    %50 = vector.broadcast %cst_13 : f32 to vector<8x128xf32>
    %51 = arith.select %43, %37, %50 : vector<8x128xi1>, vector<8x128xf32>
    %52 = arith.addf %0, %51 : vector<8x128xf32>
    %53 = arith.addf %0, %35 : vector<8x128xf32>
    %54 = arith.addf %0, %36 : vector<8x128xf32>
    %55 = arith.addf %0, %37 : vector<8x128xf32>
    %cst_14 = arith.constant 1.000000e+00 : f32
    %cst_15 = arith.constant 0.000000e+00 : f32
    %56 = vector.broadcast %cst_14 : f32 to vector<8x128xf32>
    %57 = vector.broadcast %cst_15 : f32 to vector<8x128xf32>
    %58 = arith.select %39, %56, %57 : vector<8x128xi1>, vector<8x128xf32>
    %59 = arith.addf %0, %58 : vector<8x128xf32>
    %cst_16 = arith.constant 1.000000e+00 : f32
    %cst_17 = arith.constant 0.000000e+00 : f32
    %60 = vector.broadcast %cst_16 : f32 to vector<8x128xf32>
    %61 = vector.broadcast %cst_17 : f32 to vector<8x128xf32>
    %62 = arith.select %41, %60, %61 : vector<8x128xi1>, vector<8x128xf32>
    %63 = arith.addf %0, %62 : vector<8x128xf32>
    %cst_18 = arith.constant 1.000000e+00 : f32
    %cst_19 = arith.constant 0.000000e+00 : f32
    %64 = vector.broadcast %cst_18 : f32 to vector<8x128xf32>
    %65 = vector.broadcast %cst_19 : f32 to vector<8x128xf32>
    %66 = arith.select %43, %64, %65 : vector<8x128xi1>, vector<8x128xf32>
    %67 = arith.addf %0, %66 : vector<8x128xf32>
    %68 = vector.extract_strided_slice %6 {offsets = [8, 0], sizes = [8, 128], strides = [1, 1]} : vector<32x128xf32> to vector<8x128xf32>
    %69 = vector.extract_strided_slice %10 {offsets = [8, 0], sizes = [8, 128], strides = [1, 1]} : vector<32x128xf32> to vector<8x128xf32>
    %70 = vector.extract_strided_slice %14 {offsets = [8, 0], sizes = [8, 128], strides = [1, 1]} : vector<32x128xf32> to vector<8x128xf32>
    %71 = vector.extract_strided_slice %18 {offsets = [8, 0], sizes = [8, 128], strides = [1, 1]} : vector<32x128xi32> to vector<8x128xi32>
    %72 = arith.maximumf %68, %69 : vector<8x128xf32>
    %73 = arith.maximumf %72, %70 : vector<8x128xf32>
    %74 = arith.subf %68, %73 : vector<8x128xf32>
    %75 = math.exp %74 : vector<8x128xf32>
    %76 = arith.subf %69, %73 : vector<8x128xf32>
    %77 = math.exp %76 : vector<8x128xf32>
    %78 = arith.subf %70, %73 : vector<8x128xf32>
    %79 = math.exp %78 : vector<8x128xf32>
    %80 = arith.addf %75, %77 : vector<8x128xf32>
    %81 = arith.addf %80, %79 : vector<8x128xf32>
    %cst_20 = arith.constant 1.000000e+00 : f32
    %82 = vector.broadcast %cst_20 : f32 to vector<8x128xf32>
    %83 = arith.divf %82, %81 : vector<8x128xf32>
    %84 = arith.mulf %75, %83 : vector<8x128xf32>
    %85 = arith.mulf %77, %83 : vector<8x128xf32>
    %86 = arith.mulf %79, %83 : vector<8x128xf32>
    %c0_i32_21 = arith.constant 0 : i32
    %87 = vector.broadcast %c0_i32_21 : i32 to vector<8x128xi32>
    %88 = arith.cmpi eq, %71, %87 : vector<8x128xi32>
    %c1_i32_22 = arith.constant 1 : i32
    %89 = vector.broadcast %c1_i32_22 : i32 to vector<8x128xi32>
    %90 = arith.cmpi eq, %71, %89 : vector<8x128xi32>
    %c2_i32_23 = arith.constant 2 : i32
    %91 = vector.broadcast %c2_i32_23 : i32 to vector<8x128xi32>
    %92 = arith.cmpi eq, %71, %91 : vector<8x128xi32>
    %cst_24 = arith.constant 0.000000e+00 : f32
    %93 = vector.broadcast %cst_24 : f32 to vector<8x128xf32>
    %94 = arith.select %88, %84, %93 : vector<8x128xi1>, vector<8x128xf32>
    %95 = arith.addf %46, %94 : vector<8x128xf32>
    %cst_25 = arith.constant 0.000000e+00 : f32
    %96 = vector.broadcast %cst_25 : f32 to vector<8x128xf32>
    %97 = arith.select %90, %85, %96 : vector<8x128xi1>, vector<8x128xf32>
    %98 = arith.addf %49, %97 : vector<8x128xf32>
    %cst_26 = arith.constant 0.000000e+00 : f32
    %99 = vector.broadcast %cst_26 : f32 to vector<8x128xf32>
    %100 = arith.select %92, %86, %99 : vector<8x128xi1>, vector<8x128xf32>
    %101 = arith.addf %52, %100 : vector<8x128xf32>
    %102 = arith.addf %53, %84 : vector<8x128xf32>
    %103 = arith.addf %54, %85 : vector<8x128xf32>
    %104 = arith.addf %55, %86 : vector<8x128xf32>
    %cst_27 = arith.constant 1.000000e+00 : f32
    %cst_28 = arith.constant 0.000000e+00 : f32
    %105 = vector.broadcast %cst_27 : f32 to vector<8x128xf32>
    %106 = vector.broadcast %cst_28 : f32 to vector<8x128xf32>
    %107 = arith.select %88, %105, %106 : vector<8x128xi1>, vector<8x128xf32>
    %108 = arith.addf %59, %107 : vector<8x128xf32>
    %cst_29 = arith.constant 1.000000e+00 : f32
    %cst_30 = arith.constant 0.000000e+00 : f32
    %109 = vector.broadcast %cst_29 : f32 to vector<8x128xf32>
    %110 = vector.broadcast %cst_30 : f32 to vector<8x128xf32>
    %111 = arith.select %90, %109, %110 : vector<8x128xi1>, vector<8x128xf32>
    %112 = arith.addf %63, %111 : vector<8x128xf32>
    %cst_31 = arith.constant 1.000000e+00 : f32
    %cst_32 = arith.constant 0.000000e+00 : f32
    %113 = vector.broadcast %cst_31 : f32 to vector<8x128xf32>
    %114 = vector.broadcast %cst_32 : f32 to vector<8x128xf32>
    %115 = arith.select %92, %113, %114 : vector<8x128xi1>, vector<8x128xf32>
    %116 = arith.addf %67, %115 : vector<8x128xf32>
    %117 = vector.extract_strided_slice %6 {offsets = [16, 0], sizes = [8, 128], strides = [1, 1]} : vector<32x128xf32> to vector<8x128xf32>
    %118 = vector.extract_strided_slice %10 {offsets = [16, 0], sizes = [8, 128], strides = [1, 1]} : vector<32x128xf32> to vector<8x128xf32>
    %119 = vector.extract_strided_slice %14 {offsets = [16, 0], sizes = [8, 128], strides = [1, 1]} : vector<32x128xf32> to vector<8x128xf32>
    %120 = vector.extract_strided_slice %18 {offsets = [16, 0], sizes = [8, 128], strides = [1, 1]} : vector<32x128xi32> to vector<8x128xi32>
    %121 = arith.maximumf %117, %118 : vector<8x128xf32>
    %122 = arith.maximumf %121, %119 : vector<8x128xf32>
    %123 = arith.subf %117, %122 : vector<8x128xf32>
    %124 = math.exp %123 : vector<8x128xf32>
    %125 = arith.subf %118, %122 : vector<8x128xf32>
    %126 = math.exp %125 : vector<8x128xf32>
    %127 = arith.subf %119, %122 : vector<8x128xf32>
    %128 = math.exp %127 : vector<8x128xf32>
    %129 = arith.addf %124, %126 : vector<8x128xf32>
    %130 = arith.addf %129, %128 : vector<8x128xf32>
    %cst_33 = arith.constant 1.000000e+00 : f32
    %131 = vector.broadcast %cst_33 : f32 to vector<8x128xf32>
    %132 = arith.divf %131, %130 : vector<8x128xf32>
    %133 = arith.mulf %124, %132 : vector<8x128xf32>
    %134 = arith.mulf %126, %132 : vector<8x128xf32>
    %135 = arith.mulf %128, %132 : vector<8x128xf32>
    %c0_i32_34 = arith.constant 0 : i32
    %136 = vector.broadcast %c0_i32_34 : i32 to vector<8x128xi32>
    %137 = arith.cmpi eq, %120, %136 : vector<8x128xi32>
    %c1_i32_35 = arith.constant 1 : i32
    %138 = vector.broadcast %c1_i32_35 : i32 to vector<8x128xi32>
    %139 = arith.cmpi eq, %120, %138 : vector<8x128xi32>
    %c2_i32_36 = arith.constant 2 : i32
    %140 = vector.broadcast %c2_i32_36 : i32 to vector<8x128xi32>
    %141 = arith.cmpi eq, %120, %140 : vector<8x128xi32>
    %cst_37 = arith.constant 0.000000e+00 : f32
    %142 = vector.broadcast %cst_37 : f32 to vector<8x128xf32>
    %143 = arith.select %137, %133, %142 : vector<8x128xi1>, vector<8x128xf32>
    %144 = arith.addf %95, %143 : vector<8x128xf32>
    %cst_38 = arith.constant 0.000000e+00 : f32
    %145 = vector.broadcast %cst_38 : f32 to vector<8x128xf32>
    %146 = arith.select %139, %134, %145 : vector<8x128xi1>, vector<8x128xf32>
    %147 = arith.addf %98, %146 : vector<8x128xf32>
    %cst_39 = arith.constant 0.000000e+00 : f32
    %148 = vector.broadcast %cst_39 : f32 to vector<8x128xf32>
    %149 = arith.select %141, %135, %148 : vector<8x128xi1>, vector<8x128xf32>
    %150 = arith.addf %101, %149 : vector<8x128xf32>
    %151 = arith.addf %102, %133 : vector<8x128xf32>
    %152 = arith.addf %103, %134 : vector<8x128xf32>
    %153 = arith.addf %104, %135 : vector<8x128xf32>
    %cst_40 = arith.constant 1.000000e+00 : f32
    %cst_41 = arith.constant 0.000000e+00 : f32
    %154 = vector.broadcast %cst_40 : f32 to vector<8x128xf32>
    %155 = vector.broadcast %cst_41 : f32 to vector<8x128xf32>
    %156 = arith.select %137, %154, %155 : vector<8x128xi1>, vector<8x128xf32>
    %157 = arith.addf %108, %156 : vector<8x128xf32>
    %cst_42 = arith.constant 1.000000e+00 : f32
    %cst_43 = arith.constant 0.000000e+00 : f32
    %158 = vector.broadcast %cst_42 : f32 to vector<8x128xf32>
    %159 = vector.broadcast %cst_43 : f32 to vector<8x128xf32>
    %160 = arith.select %139, %158, %159 : vector<8x128xi1>, vector<8x128xf32>
    %161 = arith.addf %112, %160 : vector<8x128xf32>
    %cst_44 = arith.constant 1.000000e+00 : f32
    %cst_45 = arith.constant 0.000000e+00 : f32
    %162 = vector.broadcast %cst_44 : f32 to vector<8x128xf32>
    %163 = vector.broadcast %cst_45 : f32 to vector<8x128xf32>
    %164 = arith.select %141, %162, %163 : vector<8x128xi1>, vector<8x128xf32>
    %165 = arith.addf %116, %164 : vector<8x128xf32>
    %166 = vector.extract_strided_slice %6 {offsets = [24, 0], sizes = [8, 128], strides = [1, 1]} : vector<32x128xf32> to vector<8x128xf32>
    %167 = vector.extract_strided_slice %10 {offsets = [24, 0], sizes = [8, 128], strides = [1, 1]} : vector<32x128xf32> to vector<8x128xf32>
    %168 = vector.extract_strided_slice %14 {offsets = [24, 0], sizes = [8, 128], strides = [1, 1]} : vector<32x128xf32> to vector<8x128xf32>
    %169 = vector.extract_strided_slice %18 {offsets = [24, 0], sizes = [8, 128], strides = [1, 1]} : vector<32x128xi32> to vector<8x128xi32>
    %170 = arith.maximumf %166, %167 : vector<8x128xf32>
    %171 = arith.maximumf %170, %168 : vector<8x128xf32>
    %172 = arith.subf %166, %171 : vector<8x128xf32>
    %173 = math.exp %172 : vector<8x128xf32>
    %174 = arith.subf %167, %171 : vector<8x128xf32>
    %175 = math.exp %174 : vector<8x128xf32>
    %176 = arith.subf %168, %171 : vector<8x128xf32>
    %177 = math.exp %176 : vector<8x128xf32>
    %178 = arith.addf %173, %175 : vector<8x128xf32>
    %179 = arith.addf %178, %177 : vector<8x128xf32>
    %cst_46 = arith.constant 1.000000e+00 : f32
    %180 = vector.broadcast %cst_46 : f32 to vector<8x128xf32>
    %181 = arith.divf %180, %179 : vector<8x128xf32>
    %182 = arith.mulf %173, %181 : vector<8x128xf32>
    %183 = arith.mulf %175, %181 : vector<8x128xf32>
    %184 = arith.mulf %177, %181 : vector<8x128xf32>
    %c0_i32_47 = arith.constant 0 : i32
    %185 = vector.broadcast %c0_i32_47 : i32 to vector<8x128xi32>
    %186 = arith.cmpi eq, %169, %185 : vector<8x128xi32>
    %c1_i32_48 = arith.constant 1 : i32
    %187 = vector.broadcast %c1_i32_48 : i32 to vector<8x128xi32>
    %188 = arith.cmpi eq, %169, %187 : vector<8x128xi32>
    %c2_i32_49 = arith.constant 2 : i32
    %189 = vector.broadcast %c2_i32_49 : i32 to vector<8x128xi32>
    %190 = arith.cmpi eq, %169, %189 : vector<8x128xi32>
    %cst_50 = arith.constant 0.000000e+00 : f32
    %191 = vector.broadcast %cst_50 : f32 to vector<8x128xf32>
    %192 = arith.select %186, %182, %191 : vector<8x128xi1>, vector<8x128xf32>
    %193 = arith.addf %144, %192 : vector<8x128xf32>
    %cst_51 = arith.constant 0.000000e+00 : f32
    %194 = vector.broadcast %cst_51 : f32 to vector<8x128xf32>
    %195 = arith.select %188, %183, %194 : vector<8x128xi1>, vector<8x128xf32>
    %196 = arith.addf %147, %195 : vector<8x128xf32>
    %cst_52 = arith.constant 0.000000e+00 : f32
    %197 = vector.broadcast %cst_52 : f32 to vector<8x128xf32>
    %198 = arith.select %190, %184, %197 : vector<8x128xi1>, vector<8x128xf32>
    %199 = arith.addf %150, %198 : vector<8x128xf32>
    %200 = arith.addf %151, %182 : vector<8x128xf32>
    %201 = arith.addf %152, %183 : vector<8x128xf32>
    %202 = arith.addf %153, %184 : vector<8x128xf32>
    %cst_53 = arith.constant 1.000000e+00 : f32
    %cst_54 = arith.constant 0.000000e+00 : f32
    %203 = vector.broadcast %cst_53 : f32 to vector<8x128xf32>
    %204 = vector.broadcast %cst_54 : f32 to vector<8x128xf32>
    %205 = arith.select %186, %203, %204 : vector<8x128xi1>, vector<8x128xf32>
    %206 = arith.addf %157, %205 : vector<8x128xf32>
    %cst_55 = arith.constant 1.000000e+00 : f32
    %cst_56 = arith.constant 0.000000e+00 : f32
    %207 = vector.broadcast %cst_55 : f32 to vector<8x128xf32>
    %208 = vector.broadcast %cst_56 : f32 to vector<8x128xf32>
    %209 = arith.select %188, %207, %208 : vector<8x128xi1>, vector<8x128xf32>
    %210 = arith.addf %161, %209 : vector<8x128xf32>
    %cst_57 = arith.constant 1.000000e+00 : f32
    %cst_58 = arith.constant 0.000000e+00 : f32
    %211 = vector.broadcast %cst_57 : f32 to vector<8x128xf32>
    %212 = vector.broadcast %cst_58 : f32 to vector<8x128xf32>
    %213 = arith.select %190, %211, %212 : vector<8x128xi1>, vector<8x128xf32>
    %214 = arith.addf %165, %213 : vector<8x128xf32>
    %c1_i32_59 = arith.constant 1 : i32
    %c0_60 = arith.constant 0 : index
    %c0_61 = arith.constant 0 : index
    %c0_62 = arith.constant 0 : index
    %c0_63 = arith.constant 0 : index
    %215 = vector.load %arg4[%c0_60, %c0_61, %c0_62, %c0_63] : memref<1x1x72x128xf32, #tpu.memory_space<vmem>>, vector<1x1x8x128xf32>
    %216 = vector.shape_cast %215 : vector<1x1x8x128xf32> to vector<8x128xf32>
    %217 = vector.shape_cast %193 : vector<8x128xf32> to vector<1x1x8x128xf32>
    tpu.vector_store %arg4[%c0_60, %c0_61, %c0_62, %c0_63], %217 {strides = array<i32>} : memref<1x1x72x128xf32, #tpu.memory_space<vmem>>, vector<1x1x8x128xf32>,
    %c0_64 = arith.constant 0 : index
    %c0_65 = arith.constant 0 : index
    %c8 = arith.constant 8 : index
    %c0_66 = arith.constant 0 : index
    %218 = vector.load %arg4[%c0_64, %c0_65, %c8, %c0_66] : memref<1x1x72x128xf32, #tpu.memory_space<vmem>>, vector<1x1x8x128xf32>
    %219 = vector.shape_cast %218 : vector<1x1x8x128xf32> to vector<8x128xf32>
    %220 = vector.shape_cast %196 : vector<8x128xf32> to vector<1x1x8x128xf32>
    tpu.vector_store %arg4[%c0_64, %c0_65, %c8, %c0_66], %220 {strides = array<i32>} : memref<1x1x72x128xf32, #tpu.memory_space<vmem>>, vector<1x1x8x128xf32>,
    %c0_67 = arith.constant 0 : index
    %c0_68 = arith.constant 0 : index
    %c16 = arith.constant 16 : index
    %c0_69 = arith.constant 0 : index
    %221 = vector.load %arg4[%c0_67, %c0_68, %c16, %c0_69] : memref<1x1x72x128xf32, #tpu.memory_space<vmem>>, vector<1x1x8x128xf32>
    %222 = vector.shape_cast %221 : vector<1x1x8x128xf32> to vector<8x128xf32>
    %223 = vector.shape_cast %199 : vector<8x128xf32> to vector<1x1x8x128xf32>
    tpu.vector_store %arg4[%c0_67, %c0_68, %c16, %c0_69], %223 {strides = array<i32>} : memref<1x1x72x128xf32, #tpu.memory_space<vmem>>, vector<1x1x8x128xf32>,
    %c0_70 = arith.constant 0 : index
    %c0_71 = arith.constant 0 : index
    %c24 = arith.constant 24 : index
    %c0_72 = arith.constant 0 : index
    %224 = vector.load %arg4[%c0_70, %c0_71, %c24, %c0_72] : memref<1x1x72x128xf32, #tpu.memory_space<vmem>>, vector<1x1x8x128xf32>
    %225 = vector.shape_cast %224 : vector<1x1x8x128xf32> to vector<8x128xf32>
    %226 = vector.shape_cast %200 : vector<8x128xf32> to vector<1x1x8x128xf32>
    tpu.vector_store %arg4[%c0_70, %c0_71, %c24, %c0_72], %226 {strides = array<i32>} : memref<1x1x72x128xf32, #tpu.memory_space<vmem>>, vector<1x1x8x128xf32>,
    %c0_73 = arith.constant 0 : index
    %c0_74 = arith.constant 0 : index
    %c32 = arith.constant 32 : index
    %c0_75 = arith.constant 0 : index
    %227 = vector.load %arg4[%c0_73, %c0_74, %c32, %c0_75] : memref<1x1x72x128xf32, #tpu.memory_space<vmem>>, vector<1x1x8x128xf32>
    %228 = vector.shape_cast %227 : vector<1x1x8x128xf32> to vector<8x128xf32>
    %229 = vector.shape_cast %201 : vector<8x128xf32> to vector<1x1x8x128xf32>
    tpu.vector_store %arg4[%c0_73, %c0_74, %c32, %c0_75], %229 {strides = array<i32>} : memref<1x1x72x128xf32, #tpu.memory_space<vmem>>, vector<1x1x8x128xf32>,
    %c0_76 = arith.constant 0 : index
    %c0_77 = arith.constant 0 : index
    %c40 = arith.constant 40 : index
    %c0_78 = arith.constant 0 : index
    %230 = vector.load %arg4[%c0_76, %c0_77, %c40, %c0_78] : memref<1x1x72x128xf32, #tpu.memory_space<vmem>>, vector<1x1x8x128xf32>
    %231 = vector.shape_cast %230 : vector<1x1x8x128xf32> to vector<8x128xf32>
    %232 = vector.shape_cast %202 : vector<8x128xf32> to vector<1x1x8x128xf32>
    tpu.vector_store %arg4[%c0_76, %c0_77, %c40, %c0_78], %232 {strides = array<i32>} : memref<1x1x72x128xf32, #tpu.memory_space<vmem>>, vector<1x1x8x128xf32>,
    %c0_79 = arith.constant 0 : index
    %c0_80 = arith.constant 0 : index
    %c48 = arith.constant 48 : index
    %c0_81 = arith.constant 0 : index
    %233 = vector.load %arg4[%c0_79, %c0_80, %c48, %c0_81] : memref<1x1x72x128xf32, #tpu.memory_space<vmem>>, vector<1x1x8x128xf32>
    %234 = vector.shape_cast %233 : vector<1x1x8x128xf32> to vector<8x128xf32>
    %235 = vector.shape_cast %206 : vector<8x128xf32> to vector<1x1x8x128xf32>
    tpu.vector_store %arg4[%c0_79, %c0_80, %c48, %c0_81], %235 {strides = array<i32>} : memref<1x1x72x128xf32, #tpu.memory_space<vmem>>, vector<1x1x8x128xf32>,
    %c0_82 = arith.constant 0 : index
    %c0_83 = arith.constant 0 : index
    %c56 = arith.constant 56 : index
    %c0_84 = arith.constant 0 : index
    %236 = vector.load %arg4[%c0_82, %c0_83, %c56, %c0_84] : memref<1x1x72x128xf32, #tpu.memory_space<vmem>>, vector<1x1x8x128xf32>
    %237 = vector.shape_cast %236 : vector<1x1x8x128xf32> to vector<8x128xf32>
    %238 = vector.shape_cast %210 : vector<8x128xf32> to vector<1x1x8x128xf32>
    tpu.vector_store %arg4[%c0_82, %c0_83, %c56, %c0_84], %238 {strides = array<i32>} : memref<1x1x72x128xf32, #tpu.memory_space<vmem>>, vector<1x1x8x128xf32>,
    %c0_85 = arith.constant 0 : index
    %c0_86 = arith.constant 0 : index
    %c64 = arith.constant 64 : index
    %c0_87 = arith.constant 0 : index
    %239 = vector.load %arg4[%c0_85, %c0_86, %c64, %c0_87] : memref<1x1x72x128xf32, #tpu.memory_space<vmem>>, vector<1x1x8x128xf32>
    %240 = vector.shape_cast %239 : vector<1x1x8x128xf32> to vector<8x128xf32>
    %241 = vector.shape_cast %214 : vector<8x128xf32> to vector<1x1x8x128xf32>
    tpu.vector_store %arg4[%c0_85, %c0_86, %c64, %c0_87], %241 {strides = array<i32>} : memref<1x1x72x128xf32, #tpu.memory_space<vmem>>, vector<1x1x8x128xf32>,
    return
  }
  func.func @transform_0(%arg0: i32, %arg1: i32) -> (i32, i32, i32, i32) {
    %c0_i32 = arith.constant 0 : i32
    %c0_i32_0 = arith.constant 0 : i32
    %c0_i32_1 = arith.constant 0 : i32
    return %arg0, %c0_i32, %arg1, %c0_i32_0 : i32, i32, i32, i32
  }
  func.func @transform_1(%arg0: i32, %arg1: i32) -> (i32, i32, i32, i32) {
    %c0_i32 = arith.constant 0 : i32
    %c0_i32_0 = arith.constant 0 : i32
    %c0_i32_1 = arith.constant 0 : i32
    return %arg0, %c0_i32, %arg1, %c0_i32_0 : i32, i32, i32, i32
  }
  func.func @transform_2(%arg0: i32, %arg1: i32) -> (i32, i32, i32, i32) {
    %c0_i32 = arith.constant 0 : i32
    %c0_i32_0 = arith.constant 0 : i32
    %c0_i32_1 = arith.constant 0 : i32
    return %arg0, %arg1, %c0_i32, %c0_i32_0 : i32, i32, i32, i32
  }
}

</mosaic_0001>

<bundles_post_ra>
// kernel: dice_loss.1
= control target key start
LH: loop header
LB: loop body
LE: loop exit
PB: predicated region body
PF: predicated region fallthrough
CT: control target
= control target key end

     0   :  { %s650_s9 = smov 0   ;;  %s652_s10 = smov 0   ;;  %s770_s0 = inlined_call_operand.vmem [shape: bf16[2,3,32,128], index: 0, kind: input, shape index: {}]   ;;  %s771_s1 = inlined_call_operand.vmem [shape: s8[2,1,32,128], index: 1, kind: input, shape index: {}]   ;;  %s772_s2 = inlined_call_operand.vmem [shape: f32[2,1,72,128], index: 2, kind: output, shape index: {}]  }
   0x1   :  { %s654_s11 = smov 0  }
   0x2 LB: > { %s24_s12 = sadd.s32 1, %s628_s10  ;;  %p508_p0 = scmp.ge.s32.totalorder %s632_s11, 1  ;;  %s632_s11 = sphi %s654_s11, %s12_s11   ;;  %s628_s10 = sphi %s652_s10, %s774_s10   ;;  %s624_s9 = sphi %s650_s9, %s773_s9  }
   0x3   : > { %p26_p1 = scmp.ge.s32.totalorder %s24_s12, 2  ;;  %p147_p2 = scmp.lt.s32.totalorder %s632_s11, 3 }
   0x5   : > { %s776_s12 = smov (%p26_p1, %s24_s12), 0  ;;  %p148_p3 = pnand %p508_p0, %p147_p2 }
   0x6   : > { %p185_p4 = scmp.lt.s32.totalorder (!%p148_p3), %s624_s9, 1 }
   0x7   : > { %151 = sbr.rel (%p148_p3) target bundleno = 78 (0x4e), region = 28 }
   0xc   : > { %s778_s9 = smov (!%p185_p4, %s624_s9), 1  ;;  %v634_v55 = vmov 0.0  }
   0xd   : > { %s551_s13 = smul.u32 48, %s778_s9  ;;  %s510_s14 = sshll.u32 %s778_s9, 3 }
   0xe   : > { %s200_s17 = scalar_lea.vmem %s771_s1, %s510_s14  ;;  %s552_s21 = smul.u32 72, %s778_s9 }
   0xf   : > { %s192_s20 = scalar_lea.vmem %s770_s0, %s551_s13  ;;  %v240_v0 = vld [vmem:[%s200_s17] sm:$0xff] }
  0x10   : > { %v523_v1 = vld [vmem:[%s192_s20] sm:$0xff]   ;;  %v546_v2 = vld [vmem:[%s192_s20 + $0x8] sm:$0xff]   ;;  %v547_v3 = vld [vmem:[%s192_s20 + $0x10] sm:$0xff]   ;;  %v678_v4 = vunpack.c.0.s8 %v240_v0  ;;  %v680_v5 = vunpack.c.1.s8 %v240_v0  ;;  %v682_v6 = vunpack.c.2.s8 %v240_v0  ;;  %v684_v7 = vunpack.c.3.s8 %v240_v0  ;;  %s718_s24 = scalar_lea.vmem %s772_s2, %s552_s21 }
  0x11   : > { %v524_v8 = vunpack.c.l.bf16 %v523_v1  ;;  %v525_v9 = vunpack.c.h.bf16 %v523_v1  ;;  %v528_v10 = vunpack.c.l.bf16 %v546_v2  ;;  %v529_v11 = vunpack.c.h.bf16 %v546_v2  ;;  %v548_v12 = vld [vmem:[%s192_s20 + $0x18] sm:$0xff]   ;;  %v549_v13 = vld [vmem:[%s192_s20 + $0x20] sm:$0xff]   ;;  %v550_v14 = vld [vmem:[%s192_s20 + $0x28] sm:$0xff]  }
  0x12   : > { %v532_v15 = vunpack.c.l.bf16 %v547_v3  ;;  %v533_v16 = vunpack.c.h.bf16 %v547_v3  ;;  %v536_v17 = vunpack.c.l.bf16 %v548_v12  ;;  %v537_v18 = vunpack.c.h.bf16 %v548_v12 }
  0x13   : > { %v540_v19 = vunpack.c.l.bf16 %v549_v13  ;;  %v541_v20 = vunpack.c.h.bf16 %v549_v13  ;;  %v544_v21 = vunpack.c.l.bf16 %v550_v14  ;;  %v545_v22 = vunpack.c.h.bf16 %v550_v14 }
  0x14   : > { %v245_v23 = vmax.f32 %v524_v8, %v532_v15  ;;  %v281_v24 = vmax.f32 %v525_v9, %v533_v16  ;;  %vm263_vm0 = vcmp.eq.s32.totalorder %v678_v4, 0  ;;  %vm299_vm1 = vcmp.eq.s32.totalorder %v680_v5, 0 }
  0x15   : > { %v317_v25 = vmax.f32 %v528_v10, %v536_v17  ;;  %v353_v26 = vmax.f32 %v529_v11, %v537_v18  ;;  %vm335_vm2 = vcmp.eq.s32.totalorder %v682_v6, 0  ;;  %vm264_vm3 = vcmp.eq.s32.totalorder %v678_v4, 1 }
  0x16   : > { %v246_v27 = vmax.f32 %v245_v23, %v540_v19  ;;  %v282_v28 = vmax.f32 %v281_v24, %v541_v20  ;;  %vm371_vm4 = vcmp.eq.s32.totalorder %v684_v7, 0  ;;  %vm300_vm5 = vcmp.eq.s32.totalorder %v680_v5, 1 }
  0x17   : > { %v318_v29 = vmax.f32 %v317_v25, %v544_v21  ;;  %v354_v30 = vmax.f32 %v353_v26, %v545_v22  ;;  %vm336_vm6 = vcmp.eq.s32.totalorder %v682_v6, 1  ;;  %vm372_vm7 = vcmp.eq.s32.totalorder %v684_v7, 1 }
  0x18   : > { %v247_v31 = vsub.f32 %v524_v8, %v246_v27  ;;  %v250_v32 = vsub.f32 %v532_v15, %v246_v27  ;;  %v253_v33 = vsub.f32 %v540_v19, %v246_v27  ;;  %v283_v34 = vsub.f32 %v525_v9, %v282_v28 }
  0x19   : > { %v286_v35 = vsub.f32 %v533_v16, %v282_v28  ;;  %v289_v36 = vsub.f32 %v541_v20, %v282_v28  ;;  %v319_v37 = vsub.f32 %v528_v10, %v318_v29  ;;  %v322_v38 = vsub.f32 %v536_v17, %v318_v29 }
  0x1a   : > { %v248_v39 = vmul.f32 1.442695, %v247_v31  ;;  %v251_v40 = vmul.f32 1.442695, %v250_v32  ;;  %v254_v41 = vmul.f32 1.442695, %v253_v33  ;;  %v325_v42 = vsub.f32 %v544_v21, %v318_v29 }
  0x1b   : > { %v284_v43 = vmul.f32 1.442695, %v283_v34  ;;  %v287_v44 = vmul.f32 1.442695, %v286_v35  ;;  %v355_v45 = vsub.f32 %v529_v11, %v354_v30  ;;  %v290_v46 = vmul.f32 1.442695, %v289_v36 }
  0x1c   : > { %578 = vpow2.f32 %v248_v39  ;;  %v320_v47 = vmul.f32 1.442695, %v319_v37  ;;  %v323_v48 = vmul.f32 1.442695, %v322_v38  ;;  %v326_v49 = vmul.f32 1.442695, %v325_v42 }
  0x1d   : > { %580 = vpow2.f32 %v251_v40  ;;  %v358_v50 = vsub.f32 %v537_v18, %v354_v30  ;;  %v361_v51 = vsub.f32 %v545_v22, %v354_v30  ;;  %v356_v52 = vmul.f32 1.442695, %v355_v45 }
  0x1e   : > { %582 = vpow2.f32 %v254_v41  ;;  %vm265_vm8 = vcmp.eq.s32.totalorder %v678_v4, 2  ;;  %vm301_vm9 = vcmp.eq.s32.totalorder %v680_v5, 2  ;;  %vm337_vm10 = vcmp.eq.s32.totalorder %v682_v6, 2 }
  0x1f   : > { %584 = vpow2.f32 %v284_v43  ;;  %v359_v53 = vmul.f32 1.442695, %v358_v50  ;;  %v362_v54 = vmul.f32 1.442695, %v361_v51  ;;  %v275_v56 = vsel %vm263_vm0, 1.0, %v634_v55 }
  0x20   : > { %586 = vpow2.f32 %v287_v44  ;;  %v311_v57 = vsel %vm299_vm1, 1.0, %v634_v55  ;;  %v347_v58 = vsel %vm335_vm2, 1.0, %v634_v55  ;;  %vm373_vm11 = vcmp.eq.s32.totalorder %v684_v7, 2 }
  0x21   : > { %588 = vpow2.f32 %v290_v46  ;;  %v312_v59 = vadd.f32 %v311_v57, %v275_v56  ;;  %v277_v60 = vsel %vm264_vm3, 1.0, %v634_v55  ;;  %v383_v61 = vsel %vm371_vm4, 1.0, %v634_v55 }
  0x22   : > { %590 = vpow2.f32 %v320_v47  ;;  %v313_v62 = vsel %vm300_vm5, 1.0, %v634_v55  ;;  %v349_v63 = vsel %vm336_vm6, 1.0, %v634_v55  ;;  %v279_v2 = vsel %vm265_vm8, 1.0, %v634_v55 }
  0x23   : > { %592 = vpow2.f32 %v323_v48  ;;  %v348_v0 = vadd.f32 %v347_v58, %v312_v59  ;;  %v314_v1 = vadd.f32 %v313_v62, %v277_v60  ;;  %v385_v3 = vsel %vm372_vm7, 1.0, %v634_v55 }
  0x24   : > { %594 = vpow2.f32 %v326_v49  ;;  %v315_v8 = vsel %vm301_vm9, 1.0, %v634_v55  ;;  %v351_v9 = vsel %vm337_vm10, 1.0, %v634_v55  ;;  %v387_v13 = vsel %vm373_vm11, 1.0, %v634_v55 }
  0x25   : > { %596 = vpow2.f32 %v356_v52  ;;  %v384_v10 = vadd.f32 %v383_v61, %v348_v0  ;;  %v350_v11 = vadd.f32 %v349_v63, %v314_v1  ;;  %v316_v12 = vadd.f32 %v315_v8, %v279_v2 }
  0x26   : > { %598 = vpow2.f32 %v359_v53 }
  0x27   : > { %600 = vpow2.f32 %v362_v54  ;;  %395 = vst [vmem:[%s718_s24 + $0x30] sm:$0xff] %v384_v10  ;;  %v386_v14 = vadd.f32 %v385_v3, %v350_v11  ;;  %v352_v15 = vadd.f32 %v351_v9, %v316_v12 }
  0x29   : > { %v579_v16 = vpop.eup %578  ;;  %396 = vst [vmem:[%s718_s24 + $0x38] sm:$0xff] %v386_v14  ;;  %v388_v17 = vadd.f32 %v387_v13, %v352_v15 }
  0x2a   : > { %v581_v18 = vpop.eup %580 }
  0x2b   : > { %v583_v19 = vpop.eup %582  ;;  %v256_v20 = vadd.f32 %v581_v18, %v579_v16  ;;  %397 = vst [vmem:[%s718_s24 + $0x40] sm:$0xff] %v388_v17 }
  0x2c   : > { %v585_v21 = vpop.eup %584 }
  0x2d   : > { %v587_v22 = vpop.eup %586  ;;  %v257_v23 = vadd.f32 %v583_v19, %v256_v20 }
  0x2e   : > { %v589_v24 = vpop.eup %588  ;;  %v292_v25 = vadd.f32 %v587_v22, %v585_v21 }
  0x2f   : > { %v591_v26 = vpop.eup %590  ;;  %602 = vrcp.f32 %v257_v23 }
  0x30   : > { %v593_v27 = vpop.eup %592  ;;  %v293_v28 = vadd.f32 %v589_v24, %v292_v25 }
  0x31   : > { %v595_v29 = vpop.eup %594  ;;  %v328_v30 = vadd.f32 %v593_v27, %v591_v26 }
  0x32   : > { %v597_v31 = vpop.eup %596  ;;  %604 = vrcp.f32 %v293_v28 }
  0x33   : > { %v599_v32 = vpop.eup %598  ;;  %v329_v33 = vadd.f32 %v595_v29, %v328_v30 }
  0x34   : > { %v601_v34 = vpop.eup %600  ;;  %v364_v35 = vadd.f32 %v599_v32, %v597_v31 }
  0x35   : > { %606 = vrcp.f32 %v329_v33 }
  0x36   : > { %v365_v36 = vadd.f32 %v601_v34, %v364_v35 }
  0x38   : > { %608 = vrcp.f32 %v365_v36 }
  0x3c   : > { %v603_v37 = vpop.eup %602 }
  0x3d   : > { %v260_v38 = vmul.f32 %v603_v37, %v579_v16  ;;  %v261_v39 = vmul.f32 %v603_v37, %v581_v18  ;;  %v262_v40 = vmul.f32 %v603_v37, %v583_v19 }
  0x3f   : > { %v605_v41 = vpop.eup %604  ;;  %v266_v42 = vsel %vm263_vm0, %v260_v38, 0.0  ;;  %v268_v44 = vsel %vm264_vm3, %v261_v39, 0.0  ;;  %v270_v47 = vsel %vm265_vm8, %v262_v40, 0.0 }
  0x40   : > { %v296_v43 = vmul.f32 %v605_v41, %v585_v21  ;;  %v297_v45 = vmul.f32 %v605_v41, %v587_v22  ;;  %v298_v46 = vmul.f32 %v605_v41, %v589_v24 }
  0x42   : > { %v607_v48 = vpop.eup %606  ;;  %v302_v49 = vsel %vm299_vm1, %v296_v43, 0.0  ;;  %v304_v50 = vsel %vm300_vm5, %v297_v45, 0.0  ;;  %v306_v51 = vsel %vm301_vm9, %v298_v46, 0.0  ;;  %v308_v52 = vadd.f32 %v296_v43, %v260_v38 }
  0x43   : > { %v303_v53 = vadd.f32 %v302_v49, %v266_v42  ;;  %v332_v54 = vmul.f32 %v607_v48, %v591_v26  ;;  %v305_v55 = vadd.f32 %v304_v50, %v268_v44  ;;  %v333_v56 = vmul.f32 %v607_v48, %v593_v27 }
  0x44   : > { %v307_v57 = vadd.f32 %v306_v51, %v270_v47  ;;  %v334_v58 = vmul.f32 %v607_v48, %v595_v29  ;;  %v309_v59 = vadd.f32 %v297_v45, %v261_v39  ;;  %v310_v4 = vadd.f32 %v298_v46, %v262_v40 }
  0x45   : > { %v609_v60 = vpop.eup %608  ;;  %v338_v61 = vsel %vm335_vm2, %v332_v54, 0.0  ;;  %v340_v62 = vsel %vm336_vm6, %v333_v56, 0.0  ;;  %v344_v63 = vadd.f32 %v332_v54, %v308_v52 }
  0x46   : > { %v339_v0 = vadd.f32 %v338_v61, %v303_v53  ;;  %v368_v5 = vmul.f32 %v609_v60, %v597_v31  ;;  %v341_v1 = vadd.f32 %v340_v62, %v305_v55  ;;  %v369_v2 = vmul.f32 %v609_v60, %v599_v32 }
  0x47   : > { %v342_v3 = vsel %vm337_vm10, %v334_v58, 0.0  ;;  %v370_v8 = vmul.f32 %v609_v60, %v601_v34  ;;  %v345_v9 = vadd.f32 %v333_v56, %v309_v59  ;;  %v346_v10 = vadd.f32 %v334_v58, %v310_v4 }
  0x48   : > { %v374_v11 = vsel %vm371_vm4, %v368_v5, 0.0  ;;  %v376_v12 = vsel %vm372_vm7, %v369_v2, 0.0  ;;  %v343_v13 = vadd.f32 %v342_v3, %v307_v57  ;;  %v380_v14 = vadd.f32 %v368_v5, %v344_v63 }
  0x49   : > { %v375_v15 = vadd.f32 %v374_v11, %v339_v0  ;;  %v377_v16 = vadd.f32 %v376_v12, %v341_v1  ;;  %v378_v6 = vsel %vm373_vm11, %v370_v8, 0.0  ;;  %v381_v17 = vadd.f32 %v369_v2, %v345_v9 }
  0x4a   : > { %v379_v18 = vadd.f32 %v378_v6, %v343_v13  ;;  %392 = vst [vmem:[%s718_s24 + $0x18] sm:$0xff] %v380_v14  ;;  %v382_v19 = vadd.f32 %v370_v8, %v346_v10 }
  0x4b   : > { %389 = vst [vmem:[%s718_s24] sm:$0xff] %v375_v15  ;;  %390 = vst [vmem:[%s718_s24 + $0x8] sm:$0xff] %v377_v16 }
  0x4c   : > { %393 = vst [vmem:[%s718_s24 + $0x20] sm:$0xff] %v381_v17  ;;  %391 = vst [vmem:[%s718_s24 + $0x10] sm:$0xff] %v379_v18 }
  0x4d   : > { %394 = vst [vmem:[%s718_s24 + $0x28] sm:$0xff] %v382_v19 }
  0x4e PF: > { %s12_s11 = sadd.s32 1, %s632_s11   ;;  %s773_s9 = smov %s628_s10 }
  0x4f   : > { %p9_p5 = scmp.ge.s32.totalorder %s12_s11, 4   ;;  %s774_s10 = smov %s776_s12 }
  0x51   :  { %11 = sbr.rel (!%p9_p5) target bundleno = 2 (0x2), region = 63 }

</bundles_post_ra>
